<compile_context>
chip_gen: v7x
topology: tpu7x:2x2x1
jax: 0.10.0
libtpu: 0.0.40
codegen_flags: <defaults>
</compile_context>

<pallas_src>
import functools

import jax
import jax.numpy as jnp
from jax.experimental import pallas as pl
from jax.experimental.pallas import tpu as pltpu

LANE = 128      # lane width (last dim)
SUBLANE = 8     # sublane width (second-to-last dim, f32)
H1, H2, H3 = 96, 128, 96


def _round_up(n: int, m: int) -> int:
    return (n + m - 1) // m * m


# -----------------------------------------------------------------------------
# Kernel: the entire MLP hot path (4 matmuls + biases + 3 tanh).
# Layer 1 runs in f32 (K = obs, tiny); layers 2-4 use bf16 weights; all
# accumulation, bias-add and tanh are f32 (v5e has no bf16 VPU/EUP path).
# -----------------------------------------------------------------------------
def policy_mlp_kernel(x_ref,
                      w1_ref, b1_ref,
                      w2_ref, b2_ref,
                      w3_ref, b3_ref,
                      w4_ref, b4_ref,
                      out_ref):
    cdt = w2_ref.dtype  # bf16 compute dtype for the hidden layers

    h = jnp.tanh(
        jnp.dot(x_ref[...], w1_ref[...], preferred_element_type=jnp.float32)
        + b1_ref[...]
    )
    h = jnp.tanh(
        jnp.dot(h.astype(cdt), w2_ref[...], preferred_element_type=jnp.float32)
        + b2_ref[...]
    )
    h = jnp.tanh(
        jnp.dot(h.astype(cdt), w3_ref[...], preferred_element_type=jnp.float32)
        + b3_ref[...]
    )
    logits = (
        jnp.dot(h.astype(cdt), w4_ref[...], preferred_element_type=jnp.float32)
        + b4_ref[...]
    )
    out_ref[...] = logits.astype(out_ref.dtype)


# -----------------------------------------------------------------------------
# Parameter packing (done once, outside the hot loop).
#   * Expects W as (in_features, out_features) == torch nn.Linear.weight.T.
#   * Layer 1: f32 weights, true K = obs_dim (no padding of the contraction).
#   * Hidden feature dims pad to 128 lanes; final out dim pads only to an
#     8-wide sublane container (lane-masked store, 16x less writeback).
#   * Biases stay f32, shaped (1, out_pad).
# -----------------------------------------------------------------------------
def pack_params(params, compute_dtype=jnp.bfloat16):
    n = len(params)
    packed = []
    for li, (w, b) in enumerate(params):
        w = jnp.asarray(w, jnp.float32)
        b = jnp.asarray(b, jnp.float32)
        assert w.ndim == 2 and b.shape == (w.shape[1],), (
            "pack_params expects W as (in_features, out_features); "
            "transpose torch nn.Linear.weight before packing.")
        fi, fo = w.shape
        first, last = (li == 0), (li == n - 1)
        wdt = jnp.float32 if first else compute_dtype
        fi_p = fi if first else _round_up(fi, LANE)
        fo_p = _round_up(fo, SUBLANE) if last else _round_up(fo, LANE)
        w_p = jnp.zeros((fi_p, fo_p), wdt).at[:fi, :fo].set(w.astype(wdt))
        b_p = jnp.zeros((1, fo_p), jnp.float32).at[:, :fo].set(b.reshape(1, -1))
        packed.append((w_p, b_p))
    return tuple(packed)


# -----------------------------------------------------------------------------
# Wrapper.
#   - B <  small_cutoff : gridless call, everything VMEM-resident (minimal
#                         launch overhead for rollout-sized batches).
#   - B >= small_cutoff : 1-D grid over >=2 batch tiles; weights stay resident
#                         (constant index_map), activations stream, batch axis
#                         "parallel" so v7x's 2 TensorCores split the work.
# -----------------------------------------------------------------------------
@functools.partial(jax.jit, static_argnames=("act_dim", "tb", "small_cutoff"))
def policy_forward(x, packed, act_dim, tb=2048, small_cutoff=512):
    (w1, b1), (w2, b2), (w3, b3), (w4, b4) = packed
    B, obs = x.shape
    act_pad = w4.shape[1]
    args = (x, w1, b1, w2, b2, w3, b3, w4, b4)

    # Cost hint for XLA scheduling of surrounding PPO ops (unpadded traffic).
    layer_dims = [w1.shape, w2.shape, w3.shape, w4.shape]
    flops = 2 * B * sum(k * n for (k, n) in layer_dims)
    transcendentals = B * (w1.shape[1] + w2.shape[1] + w3.shape[1])
    param_bytes = sum(a.size * a.dtype.itemsize for pair in packed for a in pair)
    bytes_accessed = (B * obs * x.dtype.itemsize        # x in (unpadded)
                      + B * act_pad * 4                 # logits out (8-lane f32)
                      + param_bytes)
    cost = pl.CostEstimate(flops=flops,
                           transcendentals=transcendentals,
                           bytes_accessed=bytes_accessed)

    out_shape = jax.ShapeDtypeStruct((B, act_pad), jnp.float32)

    if B < small_cutoff:
        # Launch-overhead regime: no grid, no pipelining machinery.
        vmem_spec = pl.BlockSpec(memory_space=pltpu.MemorySpace.VMEM)
        out_p = pl.pallas_call(
            policy_mlp_kernel,
            out_shape=out_shape,
            in_specs=[vmem_spec] * len(args),
            out_specs=vmem_spec,
            cost_estimate=cost,
        )(*args)
    else:
        # Batch-tiled streaming path.  >=2 tiles so v7x shards the batch over
        # both TensorCores; tb_eff picked to minimize ragged-tile zero rows
        # (rounded to 16 for bf16 sublane packing of the intermediates).
        num_tiles = max(2, pl.cdiv(B, tb))
        tb_eff = _round_up(pl.cdiv(B, num_tiles), 2 * SUBLANE)
        # Partial last block: Pallas masks the out-of-bounds writeback; garbage
        # rows in the partial input block only affect masked output rows.

        x_spec = pl.BlockSpec((tb_eff, obs), lambda i: (i, 0))
        out_spec = pl.BlockSpec((tb_eff, act_pad), lambda i: (i, 0))

        def const_spec(shape):
            # Constant block index -> Pallas keeps these resident, no re-DMA.
            return pl.BlockSpec(shape, lambda i: (0, 0))

        # VMEM budget: double-buffered x/out tiles + params + ~4 live f32
        # (tb_eff, 128) intermediates held by the compiler.  Only raise the
        # scoped-VMEM limit when tb is pushed far past the default (v5e scoped
        # default is 16 MiB; keep <= 64 MiB for v7x physical VMEM).
        est_vmem = (2 * tb_eff * obs * x.dtype.itemsize
                    + 2 * tb_eff * act_pad * 4
                    + 2 * param_bytes
                    + 4 * tb_eff * LANE * 4)
        cp_kwargs = dict(dimension_semantics=("parallel",))
        if est_vmem > 12 * 1024 * 1024:
            cp_kwargs["vmem_limit_bytes"] = min(2 * est_vmem, 64 * 1024 * 1024)

        out_p = pl.pallas_call(
            policy_mlp_kernel,
            out_shape=out_shape,
            grid=(num_tiles,),
            in_specs=[x_spec,
                      const_spec(w1.shape), const_spec(b1.shape),
                      const_spec(w2.shape), const_spec(b2.shape),
                      const_spec(w3.shape), const_spec(b3.shape),
                      const_spec(w4.shape), const_spec(b4.shape)],
            out_specs=out_spec,
            compiler_params=pltpu.CompilerParams(**cp_kwargs),
            cost_estimate=cost,
        )(*args)

    return out_p[:, :act_dim]


# -----------------------------------------------------------------------------
# Deterministic parameter init (mimics torch.nn.Linear default: U(-k, k) with
# k = 1/sqrt(fan_in)).  Weights stored as (in_features, out_features), f32.
# -----------------------------------------------------------------------------
def init_linear(key, fan_in, fan_out):
    kw, kb = jax.random.split(key)
    bound = 1.0 / jnp.sqrt(jnp.float32(fan_in))
    w = jax.random.uniform(kw, (fan_in, fan_out), jnp.float32, -bound, bound)
    b = jax.random.uniform(kb, (fan_out,), jnp.float32, -bound, bound)
    return w, b


def init_policy_params(key, obs_dim, act_dim):
    k1, k2, k3, k4 = jax.random.split(key, 4)
    return (
        init_linear(k1, obs_dim, H1),
        init_linear(k2, H1, H2),
        init_linear(k3, H2, H3),
        init_linear(k4, H3, act_dim),
    )


# Pure-JAX f32 reference (matches the torch module's math).
def policy_forward_ref(x, params):
    (w1, b1), (w2, b2), (w3, b3), (w4, b4) = params
    h = jnp.tanh(x @ w1 + b1)
    h = jnp.tanh(h @ w2 + b2)
    h = jnp.tanh(h @ w3 + b3)
    return h @ w4 + b4


if __name__ == "__main__":
    obs_dim, act_dim = 8, 4

    key = jax.random.PRNGKey(0)
    kp, kx, kx2 = jax.random.split(key, 3)

    params = init_policy_params(kp, obs_dim, act_dim)
    packed = pack_params(params)   # layer-1 f32, layers 2-4 bf16, lane-padded

    # 1) Small rollout-style batch -> gridless, fully VMEM-resident path.
    batch = 8
    x = jax.random.normal(kx, (batch, obs_dim), jnp.float32)
    out = jax.block_until_ready(policy_forward(x, packed, act_dim=act_dim))
    ref = policy_forward_ref(x, params)
    assert out.shape == (batch, act_dim)
    assert jnp.allclose(out, ref, atol=5e-2, rtol=5e-2), "small-batch mismatch"

    # 2) Training-style batch (ragged vs. the tile) -> 2-tile "parallel" grid
    #    with minimal ragged padding (tb_eff = round_up(cdiv(2500, 2), 16)).
    big_batch = 2500
    x2 = jax.random.normal(kx2, (big_batch, obs_dim), jnp.float32)
    out2 = jax.block_until_ready(policy_forward(x2, packed, act_dim=act_dim))
    ref2 = policy_forward_ref(x2, params)
    assert out2.shape == (big_batch, act_dim)
    assert jnp.allclose(out2, ref2, atol=5e-2, rtol=5e-2), "tiled-batch mismatch"

    print("KERNEL_OK")
</pallas_src>

<mosaic_0001>
module attributes {stable_mosaic.version = 11 : i64} {
  func.func @policy_mlp_kernel(%arg0: memref<8x8xf32, #tpu.memory_space<vmem>>, %arg1: memref<8x128xf32, #tpu.memory_space<vmem>>, %arg2: memref<1x128xf32, #tpu.memory_space<vmem>>, %arg3: memref<128x128xbf16, #tpu.memory_space<vmem>>, %arg4: memref<1x128xf32, #tpu.memory_space<vmem>>, %arg5: memref<128x128xbf16, #tpu.memory_space<vmem>>, %arg6: memref<1x128xf32, #tpu.memory_space<vmem>>, %arg7: memref<128x8xbf16, #tpu.memory_space<vmem>>, %arg8: memref<1x8xf32, #tpu.memory_space<vmem>>, %arg9: memref<8x8xf32, #tpu.memory_space<vmem>>) attributes {dimension_semantics = [], scalar_prefetch = 0 : i64, scratch_operands = 0 : i64, tpu.core_type = #tpu.core_type<tc>} {
    %c0 = arith.constant 0 : index
    %c0_0 = arith.constant 0 : index
    %0 = vector.load %arg0[%c0, %c0_0] : memref<8x8xf32, #tpu.memory_space<vmem>>, vector<8x8xf32>
    %c0_1 = arith.constant 0 : index
    %c0_2 = arith.constant 0 : index
    %1 = vector.load %arg1[%c0_1, %c0_2] : memref<8x128xf32, #tpu.memory_space<vmem>>, vector<8x128xf32>
    %cst = arith.constant dense<0.000000e+00> : vector<8x128xf32>
    %2 = tpu.matmul %0, %1, %cst {dimension_numbers = #tpu.dot_dimension_numbers<[1], [0], [0], [1], [0, 0, 1, 1], [], []>} : vector<8x8xf32>, vector<8x128xf32>, vector<8x128xf32> -> vector<8x128xf32>
    %c0_3 = arith.constant 0 : index
    %c0_4 = arith.constant 0 : index
    %3 = vector.load %arg2[%c0_3, %c0_4] : memref<1x128xf32, #tpu.memory_space<vmem>>, vector<1x128xf32>
    %4 = vector.broadcast %3 : vector<1x128xf32> to vector<8x128xf32>
    %5 = arith.addf %2, %4 : vector<8x128xf32>
    %6 = math.tanh %5 : vector<8x128xf32>
    %7 = arith.truncf %6 : vector<8x128xf32> to vector<8x128xbf16>
    %c0_5 = arith.constant 0 : index
    %c0_6 = arith.constant 0 : index
    %8 = vector.load %arg3[%c0_5, %c0_6] : memref<128x128xbf16, #tpu.memory_space<vmem>>, vector<128x128xbf16>
    %cst_7 = arith.constant dense<0.000000e+00> : vector<8x128xf32>
    %9 = tpu.matmul %7, %8, %cst_7 {dimension_numbers = #tpu.dot_dimension_numbers<[1], [0], [0], [1], [0, 0, 1, 1], [], []>} : vector<8x128xbf16>, vector<128x128xbf16>, vector<8x128xf32> -> vector<8x128xf32>
    %c0_8 = arith.constant 0 : index
    %c0_9 = arith.constant 0 : index
    %10 = vector.load %arg4[%c0_8, %c0_9] : memref<1x128xf32, #tpu.memory_space<vmem>>, vector<1x128xf32>
    %11 = vector.broadcast %10 : vector<1x128xf32> to vector<8x128xf32>
    %12 = arith.addf %9, %11 : vector<8x128xf32>
    %13 = math.tanh %12 : vector<8x128xf32>
    %14 = arith.truncf %13 : vector<8x128xf32> to vector<8x128xbf16>
    %c0_10 = arith.constant 0 : index
    %c0_11 = arith.constant 0 : index
    %15 = vector.load %arg5[%c0_10, %c0_11] : memref<128x128xbf16, #tpu.memory_space<vmem>>, vector<128x128xbf16>
    %cst_12 = arith.constant dense<0.000000e+00> : vector<8x128xf32>
    %16 = tpu.matmul %14, %15, %cst_12 {dimension_numbers = #tpu.dot_dimension_numbers<[1], [0], [0], [1], [0, 0, 1, 1], [], []>} : vector<8x128xbf16>, vector<128x128xbf16>, vector<8x128xf32> -> vector<8x128xf32>
    %c0_13 = arith.constant 0 : index
    %c0_14 = arith.constant 0 : index
    %17 = vector.load %arg6[%c0_13, %c0_14] : memref<1x128xf32, #tpu.memory_space<vmem>>, vector<1x128xf32>
    %18 = vector.broadcast %17 : vector<1x128xf32> to vector<8x128xf32>
    %19 = arith.addf %16, %18 : vector<8x128xf32>
    %20 = math.tanh %19 : vector<8x128xf32>
    %21 = arith.truncf %20 : vector<8x128xf32> to vector<8x128xbf16>
    %c0_15 = arith.constant 0 : index
    %c0_16 = arith.constant 0 : index
    %22 = vector.load %arg7[%c0_15, %c0_16] : memref<128x8xbf16, #tpu.memory_space<vmem>>, vector<128x8xbf16>
    %cst_17 = arith.constant dense<0.000000e+00> : vector<8x8xf32>
    %23 = tpu.matmul %21, %22, %cst_17 {dimension_numbers = #tpu.dot_dimension_numbers<[1], [0], [0], [1], [0, 0, 1, 1], [], []>} : vector<8x128xbf16>, vector<128x8xbf16>, vector<8x8xf32> -> vector<8x8xf32>
    %c0_18 = arith.constant 0 : index
    %c0_19 = arith.constant 0 : index
    %24 = vector.load %arg8[%c0_18, %c0_19] : memref<1x8xf32, #tpu.memory_space<vmem>>, vector<1x8xf32>
    %25 = vector.broadcast %24 : vector<1x8xf32> to vector<8x8xf32>
    %26 = arith.addf %23, %25 : vector<8x8xf32>
    %c0_20 = arith.constant 0 : index
    %c0_21 = arith.constant 0 : index
    %27 = vector.load %arg9[%c0_20, %c0_21] : memref<8x8xf32, #tpu.memory_space<vmem>>, vector<8x8xf32>
    tpu.vector_store %arg9[%c0_20, %c0_21], %26 {strides = array<i32>} : memref<8x8xf32, #tpu.memory_space<vmem>>, vector<8x8xf32>,
    return
  }
}

</mosaic_0001>

<bundles_post_ra>
// kernel: policy_forward.1
= control target key start
LH: loop header
LB: loop body
LE: loop exit
PB: predicated region body
PF: predicated region fallthrough
CT: control target
= control target key end

     0   :  { %14 = vsyncpa [#allocation3], 0  ;;  %s883_s0 = inlined_call_operand.vmem [shape: f32[8,8], index: 0, kind: input, shape index: {}]   ;;  %s884_s1 = inlined_call_operand.hbm [shape: f32[8,128], index: 1, kind: input, shape index: {}]   ;;  %s885_s2 = inlined_call_operand.vmem [shape: f32[1,128], index: 2, kind: input, shape index: {}]   ;;  %s886_s3 = inlined_call_operand.vmem [shape: bf16[128,128], index: 3, kind: input, shape index: {}]   ;;  %s887_s4 = inlined_call_operand.vmem [shape: f32[1,128], index: 4, kind: input, shape index: {}]   ;;  %s888_s5 = inlined_call_operand.hbm [shape: bf16[128,128], index: 5, kind: input, shape index: {}]   ;;  %s889_s6 = inlined_call_operand.vmem [shape: f32[1,128], index: 6, kind: input, shape index: {}]   ;;  %s890_s7 = inlined_call_operand.vmem [shape: bf16[128,8], index: 7, kind: input, shape index: {}]   ;;  %s891_s8 = inlined_call_operand.vmem [shape: f32[1,8], index: 8, kind: input, shape index: {}]   ;;  %s892_s9 = inlined_call_operand.vmem [shape: f32[8,8], index: 9, kind: output, shape index: {}]  }
   0x1   :  { %15 = vsyncpa [#allocation5], 0  ;;  %s695_s30 = smov [#allocation2]   ;;  %s696_s11 = smov [#allocation4]  }
   0x2   :  { %s24_s10 = sshll.u32 %s695_s30, 4  ;;  %s39_s12 = sshll.u32 %s696_s11, 4  ;;  %s25_s10 = int_to_ptr.vmem [resolvable:$true] %s24_s10  ;;  %s751_s12 = int_to_ptr.vmem [resolvable:$true] %s39_s12 }
   0x3   :  { %s647_s15 = scalar_lea.hbm %s884_s1, 128 }
   0x4   :  { %p648_p0 = scmp.ne.s32.totalorder %s884_s1, %s647_s15  ;;  %p651_p1 = scmp.lt.u32.totalorder %s647_s15, %s884_s1 }
   0x6   :  { %p653_p2 = pnand %p651_p1, %p648_p0 }
   0x8   :  { %656 = shalt.err (!%p653_p2)
}
   0x9   :  { %s657_s20 = scalar_lea.vmem %s25_s10, 128  ;;  %p662_p4 = scmp.lt.s32.totalorder %s25_s10, %s25_s10 }
   0xa   :  { %p658_p3 = scmp.ne.s32.totalorder %s25_s10, %s657_s20  ;;  %p663_p5 = scmp.lt.s32.totalorder %s657_s20, %s657_s20 }
   0xc   :  { %p664_p6 = por %p663_p5, %p662_p4 }
   0xe   :  { %p665_p7 = pnand %p664_p6, %p658_p3 }
  0x10   :  { %668 = shalt.err (!%p665_p7)
}
  0x11   :  { %27 = dma.hbm_to_vmem [thread:$0]  %s884_s1, 128, %s25_s10, [#allocation3]  }
  0x12   :  { %s669_s25 = scalar_lea.hbm %s888_s5, 1024 }
  0x13   :  { %p670_p8 = scmp.ne.s32.totalorder %s888_s5, %s669_s25  ;;  %p673_p9 = scmp.lt.u32.totalorder %s669_s25, %s888_s5 }
  0x15   :  { %p675_p10 = pnand %p673_p9, %p670_p8 }
  0x17   :  { %678 = shalt.err (!%p675_p10)
}
  0x18   :  { %s679_s30 = scalar_lea.vmem %s751_s12, 1024  ;;  %p684_p12 = scmp.lt.s32.totalorder %s751_s12, %s751_s12 }
  0x19   :  { %p680_p11 = scmp.ne.s32.totalorder %s751_s12, %s679_s30  ;;  %p685_p13 = scmp.lt.s32.totalorder %s679_s30, %s679_s30 }
  0x1b   :  { %p686_p0 = por %p685_p13, %p684_p12 }
  0x1d   :  { %p687_p1 = pnand %p686_p0, %p680_p11 }
  0x1f   :  { %690 = shalt.err (!%p687_p1)
}
  0x20   :  { %s697_s1 = smov 64   ;;  %s698_s10 = smov 4  }
  0x21   :  { %45 = dma.hbm_to_vmem [thread:$0]  %s888_s5, 1024, %s751_s12, [#allocation5], %s697_s1, %s697_s1, %s698_s10  }
  0x22   :  { %691 = dma.done.wait [#allocation3], 128  }
  0x23   :  { %692 = vsyncadd [#allocation3], 4294967168 }
  0x24   :  { %693 = dma.done.wait [#allocation5], 1024  }
  0x25   :  { %694 = vsyncadd [#allocation5], 4294966272  ;;  %v699_v0 = vmov 0.0   ;;  %vm700_vm0 = vmmov 0   ;;  %vm68_vm1 = vcmask 64512   ;;  %v60_v1 = vld [vmem:[#allocation2] sm:$0xff] }
  0x26   :  { %546 = vmatprep.subr.mxu0 %v699_v0  ;;  %548 = vmatprep.mubr.msk.f32.mxu0 %vm700_vm0, %v699_v0  ;;  %v59_v2 = vld [vmem:[%s883_s0] sm:$0xff]  ;;  %v618_v4 = vld [vmem:[%s886_s3 + $0x8] sm:$0xff]   ;;  %v619_v5 = vld [vmem:[%s886_s3 + $0x10] sm:$0xff]  }
  0x27   :  { %551 = vmatprep.subr.bf16.mxu1 %v699_v0  ;;  %567 = vmatprep.mubr.msk.bf16.mxu1 %vm700_vm0, %v699_v0  ;;  %v617_v3 = vld [vmem:[%s886_s3] sm:$0xff]   ;;  %v620_v6 = vld [vmem:[%s886_s3 + $0x18] sm:$0xff]   ;;  %v622_v8 = vld [vmem:[%s886_s3 + $0x28] sm:$0xff]  }
  0x28   :  { %547 = vmatpush3.msra.mxu0 %v60_v1  ;;  %552 = vmatpush3.bf16.msra.mxu1 %v617_v3  ;;  %v621_v7 = vld [vmem:[%s886_s3 + $0x20] sm:$0xff]   ;;  %v623_v9 = vld [vmem:[%s886_s3 + $0x30] sm:$0xff]   ;;  %v624_v10 = vld [vmem:[%s886_s3 + $0x38] sm:$0xff]  }
  0x29   :  { %549 = vmatmul.mubr.msk.f32.vlgmr.msra.gmra.mrb[0].mxu0 %vm68_vm1, %v59_v2  ;;  %571 = vmatprep.subr.bf16.mxu0 %v699_v0  ;;  %v625_v11 = vld [vmem:[#allocation4] sm:$0xff]   ;;  %v626_v12 = vld [vmem:[#allocation4 + $0x8] sm:$0xff]   ;;  %v627_v13 = vld [vmem:[#allocation4 + $0x10] sm:$0xff]  }
  0x2a   :  { %587 = vmatprep.mubr.msk.bf16.mxu0 %vm700_vm0, %v699_v0  ;;  %553 = vmatprep.subr.bf16.mxu1 %v699_v0  ;;  %v628_v14 = vld [vmem:[#allocation4 + $0x18] sm:$0xff]   ;;  %v629_v21 = vld [vmem:[#allocation4 + $0x20] sm:$0xff]   ;;  %v630_v22 = vld [vmem:[#allocation4 + $0x28] sm:$0xff]  }
  0x2b   :  { %572 = vmatpush3.bf16.msra.mxu0 %v625_v11  ;;  %v488_v15 = vld [vmem:[%s885_s2] ss:$0 sm:$0xff]  ;;  %v631_v23 = vld [vmem:[#allocation4 + $0x30] sm:$0xff]   ;;  %v634_v26 = vld [vmem:[%s890_s7 + $0x8] sm:$0xff]  }
  0x2c   :  { %554 = vmatpush3.bf16.msra.mxu1 %v618_v4  ;;  %573 = vmatprep.subr.bf16.mxu0 %v699_v0  ;;  %v632_v24 = vld [vmem:[#allocation4 + $0x38] sm:$0xff]   ;;  %v635_v27 = vld [vmem:[%s890_s7 + $0x10] sm:$0xff]   ;;  %v636_v28 = vld [vmem:[%s890_s7 + $0x18] sm:$0xff]  }
  0x2d   :  { %555 = vmatprep.subr.bf16.mxu1 %v699_v0  ;;  %v633_v25 = vld [vmem:[%s890_s7] sm:$0xff]   ;;  %v638_v38 = vld [vmem:[%s890_s7 + $0x28] sm:$0xff]   ;;  %v639_v39 = vld [vmem:[%s890_s7 + $0x30] sm:$0xff]  }
  0x2e   :  { %v490_v29 = vld [vmem:[%s887_s4] ss:$0 sm:$0xff]  ;;  %v640_v40 = vld [vmem:[%s890_s7 + $0x38] sm:$0xff]  }
  0x2f   :  { %574 = vmatpush3.bf16.msra.mxu0 %v626_v12  ;;  %v637_v37 = vld [vmem:[%s890_s7 + $0x20] sm:$0xff]  }
  0x30   :  { %556 = vmatpush3.bf16.msra.mxu1 %v619_v5  ;;  %575 = vmatprep.subr.bf16.mxu0 %v699_v0  ;;  %v499_v41 = vld [vmem:[%s889_s6] ss:$0 sm:$0xff] }
  0x31   :  { %557 = vmatprep.subr.bf16.mxu1 %v699_v0  ;;  %v508_v49 = vld [vmem:[%s891_s8] ss:$0 sm:$0xff] }
  0x33   :  { %576 = vmatpush3.bf16.msra.mxu0 %v627_v13 }
  0x34   :  { %558 = vmatpush3.bf16.msra.mxu1 %v620_v6  ;;  %577 = vmatprep.subr.bf16.mxu0 %v699_v0 }
  0x35   :  { %559 = vmatprep.subr.bf16.mxu1 %v699_v0 }
  0x37   :  { %578 = vmatpush3.bf16.msra.mxu0 %v628_v14 }
  0x38   :  { %560 = vmatpush3.bf16.msra.mxu1 %v621_v7  ;;  %579 = vmatprep.subr.bf16.mxu0 %v699_v0 }
  0x39   :  { %561 = vmatprep.subr.bf16.mxu1 %v699_v0 }
  0x3b   :  { %580 = vmatpush3.bf16.msra.mxu0 %v629_v21 }
  0x3c   :  { %562 = vmatpush3.bf16.msra.mxu1 %v622_v8  ;;  %581 = vmatprep.subr.bf16.mxu0 %v699_v0 }
  0x3d   :  { %563 = vmatprep.subr.bf16.mxu1 %v699_v0 }
  0x3f   :  { %582 = vmatpush3.bf16.msra.mxu0 %v630_v22 }
  0x40   :  { %564 = vmatpush3.bf16.msra.mxu1 %v623_v9  ;;  %583 = vmatprep.subr.bf16.mxu0 %v699_v0 }
  0x41   :  { %565 = vmatprep.subr.bf16.mxu1 %v699_v0 }
  0x43   :  { %584 = vmatpush3.bf16.msra.mxu0 %v631_v23 }
  0x44   :  { %566 = vmatpush3.bf16.msra.mxu1 %v624_v10  ;;  %585 = vmatprep.subr.bf16.mxu0 %v699_v0 }
  0x45   :  { %591 = vmatprep.subr.bf16.mxu1 %v699_v0 }
  0x47   :  { %586 = vmatpush3.bf16.msra.mxu0 %v632_v24 }
  0xfc   :  { %v138_v16 = vpop.f32.mrb[0].mxu0 }
  0xfd   :  { %v139_v17 = vadd.f32 %v488_v15, %v138_v16  ;;  %v550_v18 = vpop.f32.mrb[1].mxu0 }
  0xff   :  { %641 = vtanh.f32 %v139_v17 }
 0x109   :  { %v642_v19 = vpop.eup %641 }
 0x10a   :  { %v143_v20 = vpack.c.bf16 %v642_v19, %v642_v19 }
 0x10c   :  { %568 = vmatmul.mubr.bf16.vlgmr.msra.gmra.mrb[0].mxu1 %v143_v20 }
 0x10d   :  { %607 = vmatprep.mubr.msk.bf16.mxu1 %vm700_vm0, %v699_v0  ;;  %592 = vmatpush3.bf16.msra.mxu1 %v633_v25 }
 0x10e   :  { %593 = vmatprep.subr.bf16.mxu1 %v699_v0 }
 0x111   :  { %594 = vmatpush3.bf16.msra.mxu1 %v634_v26 }
 0x112   :  { %595 = vmatprep.subr.bf16.mxu1 %v699_v0 }
 0x115   :  { %596 = vmatpush3.bf16.msra.mxu1 %v635_v27 }
 0x116   :  { %597 = vmatprep.subr.bf16.mxu1 %v699_v0 }
 0x119   :  { %598 = vmatpush3.bf16.msra.mxu1 %v636_v28 }
 0x11a   :  { %599 = vmatprep.subr.bf16.mxu1 %v699_v0 }
 0x11d   :  { %600 = vmatpush3.bf16.msra.mxu1 %v637_v37 }
 0x11e   :  { %601 = vmatprep.subr.bf16.mxu1 %v699_v0 }
 0x121   :  { %602 = vmatpush3.bf16.msra.mxu1 %v638_v38 }
 0x122   :  { %603 = vmatprep.subr.bf16.mxu1 %v699_v0 }
 0x125   :  { %604 = vmatpush3.bf16.msra.mxu1 %v639_v39 }
 0x126   :  { %605 = vmatprep.subr.bf16.mxu1 %v699_v0 }
 0x129   :  { %606 = vmatpush3.bf16.msra.mxu1 %v640_v40 }
 0x1df   :  { %v249_v30 = vpop.f32.mrb[0].mxu1 }
 0x1e0   :  { %v250_v31 = vadd.f32 %v490_v29, %v249_v30  ;;  %v569_v32 = vpop.f32.mrb[1].mxu1 }
 0x1e1   :  { %v252_v33 = vpop.f32.mrb[2].mxu1 }
 0x1e2   :  { %643 = vtanh.f32 %v250_v31  ;;  %v570_v34 = vpop.f32.mrb[3].mxu1 }
 0x1ec   :  { %v644_v35 = vpop.eup %643 }
 0x1ed   :  { %v256_v36 = vpack.c.bf16 %v644_v35, %v644_v35 }
 0x1ef   :  { %588 = vmatmul.mubr.bf16.vlgmr.msra.gmra.mrb[4].mxu0 %v256_v36 }
 0x2c2   :  { %v362_v42 = vpop.f32.mrb[4].mxu0 }
 0x2c3   :  { %v363_v43 = vadd.f32 %v499_v41, %v362_v42  ;;  %v589_v44 = vpop.f32.mrb[5].mxu0 }
 0x2c4   :  { %v365_v45 = vpop.f32.mrb[6].mxu0 }
 0x2c5   :  { %645 = vtanh.f32 %v363_v43  ;;  %v590_v46 = vpop.f32.mrb[7].mxu0 }
 0x2cf   :  { %v646_v47 = vpop.eup %645 }
 0x2d0   :  { %v369_v48 = vpack.c.bf16 %v646_v47, %v646_v47 }
 0x2d2   :  { %608 = vmatmul.mubr.bf16.vlgmr.msra.gmra.mrb[4].mxu1 %v369_v48 }
 0x3a5   :  { %v475_v50 = vpop.f32.mrb[4].mxu1 }
 0x3a6   :  { %v476_v51 = vadd.f32 %v508_v49, %v475_v50  ;;  %v609_v52 = vpop.f32.mrb[5].mxu1 }
 0x3a7   :  { %v478_v53 = vpop.f32.mrb[6].mxu1 }
 0x3a8   :  { %481 = vst.msk [vmem:[%s892_s9] sm:$0xff] %vm68_vm1, %v476_v51  ;;  %v610_v54 = vpop.f32.mrb[7].mxu1 }
 0x3a9   :  { %486 = vsyncpa [#allocation3], 1 }
 0x3aa   :  { %487 = vsyncpa [#allocation5], 1 }

</bundles_post_ra>
